<compile_context>
chip_gen: v7x
topology: tpu7x:2x2x1
jax: 0.10.0
libtpu: 0.0.40
codegen_flags: <defaults>
</compile_context>

<pallas_src>
import jax
import jax.numpy as jnp
from jax.experimental import pallas as pl
from jax.experimental.pallas import tpu as pltpu

EMBEDDING_DIM = 6
HIDDEN_DIM = 6
LANE = 128       # output lane width / total packed-gate width
G = 32           # per-gate lane slot (4 * G == LANE); also h/c lane width
E_LANE = 32      # embedding feature lane width
NEG_INF = -1e30  # bias value for padded tag lanes (masks them out of log_softmax)


def lstm_tagger_kernel(idx_ref, emb_ref, w_ih_ref, w_hh_ref, b_ref,
                       w_tag_ref, b_tag_ref, out_ref, x_ref, hid_ref):
    """Full forward: gather -> LSTM recurrence -> hidden2tag -> log_softmax.

    idx_ref:   (S,)          int32  SMEM  token indices (clamped in wrapper)
    emb_ref:   (V_pad, 32)   f32    VMEM  lane-padded embedding table
    w_ih_ref:  (32, 128)     f32    VMEM  input->gates, gate slots [i|f|o|g], 32 lanes each
    w_hh_ref:  (32, 128)     f32    VMEM  hidden->gates, same layout (only 4 vregs)
    b_ref:     (1, 128)      f32    VMEM  b_ih + b_hh, same layout (zero padding)
    w_tag_ref: (32, 128)     f32    VMEM  hidden2tag weights (transposed, padded)
    b_tag_ref: (1, 128)      f32    VMEM  hidden2tag bias (-1e30 in padded lanes)
    out_ref:   (S_pad, 128)  f32    VMEM  log_softmax scores (real block is [:S, :T])
    x_ref:     (S_pad, 32)   f32    VMEM  scratch: gathered embeddings
    hid_ref:   (S_pad, 32)   f32    VMEM  scratch: per-step hidden states
    """
    S = idx_ref.shape[0]

    # --- embedding gather into a native (S_pad, 32) block; padded rows stay 0 ----
    x_ref[...] = jnp.zeros_like(x_ref)
    hid_ref[...] = jnp.zeros_like(hid_ref)
    for t in range(S):
        x_ref[pl.ds(t, 1), :] = emb_ref[pl.ds(idx_ref[t], 1), :]

    # --- hoisted input projection (off the serial chain): one (8,32)x(32,128) ----
    gates_x = jnp.dot(x_ref[...], w_ih_ref[...],
                      preferred_element_type=jnp.float32) + b_ref[...]   # (S_pad, 128)

    # --- recurrence: fully unrolled, h/c carried in vregs, W_hh loaded once ------
    # TODO(synk): pltpu.matmul_push_rhs / matmul_acc_lhs could latch W_hh inside the
    # MXU across steps; at (32,128) = 4 vregs the plain jnp.dot is already cheap.
    w_hh = w_hh_ref[...]                                                 # 4 vregs
    h = jnp.zeros((1, G), jnp.float32)
    c = jnp.zeros((1, G), jnp.float32)
    for t in range(S):
        gates = gates_x[t:t + 1, :] + jnp.dot(
            h, w_hh, preferred_element_type=jnp.float32)                 # (1, 128)
        # gate layout [i | f | o | g], 32 lanes each. Padded lanes inside each slot
        # are exactly 0 -> sigmoid = 0.5, tanh = 0 -> padded lanes of c/h stay 0.
        sig = jax.nn.sigmoid(gates)      # i/f/o slots (one EUP vreg)
        th = jnp.tanh(gates)             # g slot      (one EUP vreg)
        i_g = sig[:, 0 * G:1 * G]
        f_g = sig[:, 1 * G:2 * G]
        o_g = sig[:, 2 * G:3 * G]
        g_g = th[:, 3 * G:4 * G]
        c = f_g * c + i_g * g_g
        h = o_g * jnp.tanh(c)
        hid_ref[pl.ds(t, 1), :] = h

    # --- epilogue: one matmul on the (S_pad, 32) block, one lane-dense store -----
    tag = jnp.dot(hid_ref[...], w_tag_ref[...],
                  preferred_element_type=jnp.float32) + b_tag_ref[...]   # (S_pad, 128)
    # padded tag lanes carry a -1e30 bias -> exp underflows to 0, max unaffected.
    m = jnp.max(tag, axis=1, keepdims=True)
    lse = jnp.log(jnp.sum(jnp.exp(tag - m), axis=1, keepdims=True)) + m
    out_ref[...] = tag - lse


def _pack_gate_weights(w, in_dim, hidden_dim, in_lanes):
    """(4H, in) PyTorch gate order [i,f,g,o] -> (in_lanes, 128) transposed, slots [i,f,o,g]."""
    H = hidden_dim
    parts = (w[0:H], w[H:2 * H], w[3 * H:4 * H], w[2 * H:3 * H])   # i, f, o, g
    out = jnp.zeros((in_lanes, 4 * G), jnp.float32)
    for k, p in enumerate(parts):
        out = out.at[:in_dim, k * G:k * G + H].set(p.T.astype(jnp.float32))
    return out


def _pack_gate_bias(b, hidden_dim):
    H = hidden_dim
    parts = (b[0:H], b[H:2 * H], b[3 * H:4 * H], b[2 * H:3 * H])   # i, f, o, g
    out = jnp.zeros((1, 4 * G), jnp.float32)
    for k, p in enumerate(parts):
        out = out.at[0, k * G:k * G + H].set(p.astype(jnp.float32))
    return out


def pack_params(params):
    """One-time packing of PyTorch-layout params into the kernel layout.

    Hoisted out of the per-call path: at these shapes the repacking scatters would
    otherwise dominate wall clock of every forward call.
    """
    emb_table = params["embedding"]                  # (V, E)
    w_ih, w_hh = params["w_ih"], params["w_hh"]      # (4H, E), (4H, H)
    b_ih, b_hh = params["b_ih"], params["b_hh"]      # (4H,), (4H,)
    w_tag, b_tag = params["w_tag"], params["b_tag"]  # (T, H), (T,)

    V, E = emb_table.shape
    H = w_hh.shape[1]
    T = w_tag.shape[0]
    assert E <= E_LANE and H <= G and T <= LANE
    V_pad = ((V + 7) // 8) * 8

    packed = {
        "emb": jnp.zeros((V_pad, E_LANE), jnp.float32).at[:V, :E].set(
            emb_table.astype(jnp.float32)),
        "w_ih": _pack_gate_weights(w_ih, E, H, E_LANE),        # (32, 128)
        "w_hh": _pack_gate_weights(w_hh, H, H, G),             # (32, 128)
        "b": _pack_gate_bias(b_ih + b_hh, H),                  # (1, 128)
        "w_tag": jnp.zeros((G, LANE), jnp.float32).at[:H, :T].set(
            w_tag.T.astype(jnp.float32)),
        "b_tag": jnp.full((1, LANE), NEG_INF, jnp.float32).at[0, :T].set(
            b_tag.astype(jnp.float32)),
    }
    meta = {"vocab_size": V, "tagset_size": T}
    return packed, meta


def lstm_tagger_forward(sentence_idx, packed, meta):
    """sentence_idx: (S,) int token ids. Returns (S, tagset) float32 log-probs."""
    S = int(sentence_idx.shape[0])
    S_pad = max(8, ((S + 7) // 8) * 8)
    # Clamp ids: in-kernel VMEM gathers are never bounds-checked.
    idx = jnp.clip(sentence_idx.astype(jnp.int32), 0, meta["vocab_size"] - 1)

    vmem = pl.BlockSpec(memory_space=pltpu.MemorySpace.VMEM)
    smem = pl.BlockSpec(memory_space=pltpu.MemorySpace.SMEM)
    out_pad = pl.pallas_call(
        lstm_tagger_kernel,
        out_shape=jax.ShapeDtypeStruct((S_pad, LANE), jnp.float32),
        in_specs=[smem, vmem, vmem, vmem, vmem, vmem, vmem],
        out_specs=vmem,
        scratch_shapes=[pltpu.VMEM((S_pad, E_LANE), jnp.float32),   # gathered embeddings
                        pltpu.VMEM((S_pad, G), jnp.float32)],       # per-step hidden states
    )(idx, packed["emb"], packed["w_ih"], packed["w_hh"], packed["b"],
      packed["w_tag"], packed["b_tag"])
    # TODO(synk): for multi-sentence throughput, add a leading batch grid axis with
    # dimension_semantics=("parallel",), carry h/c as (B, 32), and give the weights a
    # constant index_map so they stay VMEM-resident across the grid (2 TCs on v7x).
    # TODO(synk): for realistic vocab on v7x (64 MiB VMEM), keep the embedding table
    # in HBM (memory_space=pl.ANY) and DMA only the S needed rows via make_async_copy.
    return out_pad[:S, :meta["tagset_size"]]


def init_params(key, vocab_size, tagset_size, embedding_dim=EMBEDDING_DIM,
                hidden_dim=HIDDEN_DIM):
    ks = jax.random.split(key, 7)
    k = 1.0 / jnp.sqrt(hidden_dim)
    kt = 1.0 / jnp.sqrt(hidden_dim)
    return {
        # nn.Embedding default init ~ N(0, 1)
        "embedding": jax.random.normal(ks[0], (vocab_size, embedding_dim), jnp.float32),
        # nn.LSTM default init ~ U(-1/sqrt(H), 1/sqrt(H)), PyTorch gate order [i,f,g,o]
        "w_ih": jax.random.uniform(ks[1], (4 * hidden_dim, embedding_dim), jnp.float32, -k, k),
        "w_hh": jax.random.uniform(ks[2], (4 * hidden_dim, hidden_dim), jnp.float32, -k, k),
        "b_ih": jax.random.uniform(ks[3], (4 * hidden_dim,), jnp.float32, -k, k),
        "b_hh": jax.random.uniform(ks[4], (4 * hidden_dim,), jnp.float32, -k, k),
        # nn.Linear default init ~ U(-1/sqrt(fan_in), 1/sqrt(fan_in))
        "w_tag": jax.random.uniform(ks[5], (tagset_size, hidden_dim), jnp.float32, -kt, kt),
        "b_tag": jax.random.uniform(ks[6], (tagset_size,), jnp.float32, -kt, kt),
    }


def reference_forward(sentence_idx, params):
    """Pure-JAX reference matching PyTorch LSTM semantics, for verification."""
    emb = jnp.take(params["embedding"], sentence_idx, axis=0)
    H = params["w_hh"].shape[1]
    w_ih, w_hh = params["w_ih"], params["w_hh"]
    b = params["b_ih"] + params["b_hh"]

    def step(carry, x):
        h, c = carry
        g = x @ w_ih.T + h @ w_hh.T + b
        i = jax.nn.sigmoid(g[0:H])
        f = jax.nn.sigmoid(g[H:2 * H])
        gg = jnp.tanh(g[2 * H:3 * H])
        o = jax.nn.sigmoid(g[3 * H:4 * H])
        c_new = f * c + i * gg
        h_new = o * jnp.tanh(c_new)
        return (h_new, c_new), h_new

    (_, _), hs = jax.lax.scan(step, (jnp.zeros((H,)), jnp.zeros((H,))), emb)
    tag = hs @ params["w_tag"].T + params["b_tag"]
    return jax.nn.log_softmax(tag, axis=1)


if __name__ == "__main__":
    # Build vocab / tags from the training data in the original script.
    training_data = [
        ("The dog ate the apple".split(), ["DET", "NN", "V", "DET", "NN"]),
        ("Everybody read that book".split(), ["NN", "V", "DET", "NN"]),
    ]
    word_to_idx = {}
    for sent, _ in training_data:
        for w in sent:
            if w not in word_to_idx:
                word_to_idx[w] = len(word_to_idx)
    tag_to_idx = {"DET": 0, "NN": 1, "V": 2}

    params = init_params(jax.random.PRNGKey(0), len(word_to_idx), len(tag_to_idx))
    packed, meta = pack_params(params)   # one-time packing, hoisted out of the call path

    # prepare_sequence(training_data[0][0], word_to_idx)
    sentence = jnp.array([word_to_idx[w] for w in training_data[0][0]], dtype=jnp.int32)

    tag_scores = lstm_tagger_forward(sentence, packed, meta)
    tag_scores = jax.block_until_ready(tag_scores)

    ref = reference_forward(sentence, params)
    assert tag_scores.shape == (sentence.shape[0], len(tag_to_idx))
    assert jnp.allclose(tag_scores, ref, atol=1e-4, rtol=1e-4)
    print("KERNEL_OK")
</pallas_src>

<mosaic_0001>
module attributes {stable_mosaic.version = 11 : i64} {
  func.func @lstm_tagger_kernel(%arg0: memref<5xi32, #tpu.memory_space<smem>>, %arg1: memref<16x32xf32, #tpu.memory_space<vmem>>, %arg2: memref<32x128xf32, #tpu.memory_space<vmem>>, %arg3: memref<32x128xf32, #tpu.memory_space<vmem>>, %arg4: memref<1x128xf32, #tpu.memory_space<vmem>>, %arg5: memref<32x128xf32, #tpu.memory_space<vmem>>, %arg6: memref<1x128xf32, #tpu.memory_space<vmem>>, %arg7: memref<8x128xf32, #tpu.memory_space<vmem>>, %arg8: memref<8x32xf32, #tpu.memory_space<vmem>>, %arg9: memref<8x32xf32, #tpu.memory_space<vmem>>) attributes {dimension_semantics = [], scalar_prefetch = 0 : i64, scratch_operands = 2 : i64, tpu.core_type = #tpu.core_type<tc>} {
    %cst = arith.constant 0.000000e+00 : f32
    %0 = vector.broadcast %cst : f32 to vector<8x32xf32>
    %c0 = arith.constant 0 : index
    %c0_0 = arith.constant 0 : index
    %1 = vector.load %arg8[%c0, %c0_0] : memref<8x32xf32, #tpu.memory_space<vmem>>, vector<8x32xf32>
    tpu.vector_store %arg8[%c0, %c0_0], %0 {strides = array<i32>} : memref<8x32xf32, #tpu.memory_space<vmem>>, vector<8x32xf32>,
    %cst_1 = arith.constant 0.000000e+00 : f32
    %2 = vector.broadcast %cst_1 : f32 to vector<8x32xf32>
    %c0_2 = arith.constant 0 : index
    %c0_3 = arith.constant 0 : index
    %3 = vector.load %arg9[%c0_2, %c0_3] : memref<8x32xf32, #tpu.memory_space<vmem>>, vector<8x32xf32>
    tpu.vector_store %arg9[%c0_2, %c0_3], %2 {strides = array<i32>} : memref<8x32xf32, #tpu.memory_space<vmem>>, vector<8x32xf32>,
    %c0_4 = arith.constant 0 : index
    %4 = memref.load %arg0[%c0_4] : memref<5xi32, #tpu.memory_space<smem>>
    %5 = arith.index_cast %4 : i32 to index
    %c0_5 = arith.constant 0 : index
    %6 = vector.load %arg1[%5, %c0_5] : memref<16x32xf32, #tpu.memory_space<vmem>>, vector<1x32xf32>
    %c0_6 = arith.constant 0 : index
    %c0_7 = arith.constant 0 : index
    %7 = vector.load %arg8[%c0_6, %c0_7] : memref<8x32xf32, #tpu.memory_space<vmem>>, vector<1x32xf32>
    tpu.vector_store %arg8[%c0_6, %c0_7], %6 {strides = array<i32>} : memref<8x32xf32, #tpu.memory_space<vmem>>, vector<1x32xf32>,
    %c1 = arith.constant 1 : index
    %8 = memref.load %arg0[%c1] : memref<5xi32, #tpu.memory_space<smem>>
    %9 = arith.index_cast %8 : i32 to index
    %c0_8 = arith.constant 0 : index
    %10 = vector.load %arg1[%9, %c0_8] : memref<16x32xf32, #tpu.memory_space<vmem>>, vector<1x32xf32>
    %c1_9 = arith.constant 1 : index
    %c0_10 = arith.constant 0 : index
    %11 = vector.load %arg8[%c1_9, %c0_10] : memref<8x32xf32, #tpu.memory_space<vmem>>, vector<1x32xf32>
    tpu.vector_store %arg8[%c1_9, %c0_10], %10 {strides = array<i32>} : memref<8x32xf32, #tpu.memory_space<vmem>>, vector<1x32xf32>,
    %c2 = arith.constant 2 : index
    %12 = memref.load %arg0[%c2] : memref<5xi32, #tpu.memory_space<smem>>
    %13 = arith.index_cast %12 : i32 to index
    %c0_11 = arith.constant 0 : index
    %14 = vector.load %arg1[%13, %c0_11] : memref<16x32xf32, #tpu.memory_space<vmem>>, vector<1x32xf32>
    %c2_12 = arith.constant 2 : index
    %c0_13 = arith.constant 0 : index
    %15 = vector.load %arg8[%c2_12, %c0_13] : memref<8x32xf32, #tpu.memory_space<vmem>>, vector<1x32xf32>
    tpu.vector_store %arg8[%c2_12, %c0_13], %14 {strides = array<i32>} : memref<8x32xf32, #tpu.memory_space<vmem>>, vector<1x32xf32>,
    %c3 = arith.constant 3 : index
    %16 = memref.load %arg0[%c3] : memref<5xi32, #tpu.memory_space<smem>>
    %17 = arith.index_cast %16 : i32 to index
    %c0_14 = arith.constant 0 : index
    %18 = vector.load %arg1[%17, %c0_14] : memref<16x32xf32, #tpu.memory_space<vmem>>, vector<1x32xf32>
    %c3_15 = arith.constant 3 : index
    %c0_16 = arith.constant 0 : index
    %19 = vector.load %arg8[%c3_15, %c0_16] : memref<8x32xf32, #tpu.memory_space<vmem>>, vector<1x32xf32>
    tpu.vector_store %arg8[%c3_15, %c0_16], %18 {strides = array<i32>} : memref<8x32xf32, #tpu.memory_space<vmem>>, vector<1x32xf32>,
    %c4 = arith.constant 4 : index
    %20 = memref.load %arg0[%c4] : memref<5xi32, #tpu.memory_space<smem>>
    %21 = arith.index_cast %20 : i32 to index
    %c0_17 = arith.constant 0 : index
    %22 = vector.load %arg1[%21, %c0_17] : memref<16x32xf32, #tpu.memory_space<vmem>>, vector<1x32xf32>
    %c4_18 = arith.constant 4 : index
    %c0_19 = arith.constant 0 : index
    %23 = vector.load %arg8[%c4_18, %c0_19] : memref<8x32xf32, #tpu.memory_space<vmem>>, vector<1x32xf32>
    tpu.vector_store %arg8[%c4_18, %c0_19], %22 {strides = array<i32>} : memref<8x32xf32, #tpu.memory_space<vmem>>, vector<1x32xf32>,
    %c0_20 = arith.constant 0 : index
    %c0_21 = arith.constant 0 : index
    %24 = vector.load %arg8[%c0_20, %c0_21] : memref<8x32xf32, #tpu.memory_space<vmem>>, vector<8x32xf32>
    %c0_22 = arith.constant 0 : index
    %c0_23 = arith.constant 0 : index
    %25 = vector.load %arg2[%c0_22, %c0_23] : memref<32x128xf32, #tpu.memory_space<vmem>>, vector<32x128xf32>
    %cst_24 = arith.constant dense<0.000000e+00> : vector<8x128xf32>
    %26 = tpu.matmul %24, %25, %cst_24 {dimension_numbers = #tpu.dot_dimension_numbers<[1], [0], [0], [1], [0, 0, 1, 1], [], []>} : vector<8x32xf32>, vector<32x128xf32>, vector<8x128xf32> -> vector<8x128xf32>
    %c0_25 = arith.constant 0 : index
    %c0_26 = arith.constant 0 : index
    %27 = vector.load %arg4[%c0_25, %c0_26] : memref<1x128xf32, #tpu.memory_space<vmem>>, vector<1x128xf32>
    %28 = vector.broadcast %27 : vector<1x128xf32> to vector<8x128xf32>
    %29 = arith.addf %26, %28 : vector<8x128xf32>
    %c0_27 = arith.constant 0 : index
    %c0_28 = arith.constant 0 : index
    %30 = vector.load %arg3[%c0_27, %c0_28] : memref<32x128xf32, #tpu.memory_space<vmem>>, vector<32x128xf32>
    %cst_29 = arith.constant 0.000000e+00 : f32
    %31 = vector.broadcast %cst_29 : f32 to vector<1x32xf32>
    %cst_30 = arith.constant 0.000000e+00 : f32
    %32 = vector.broadcast %cst_30 : f32 to vector<1x32xf32>
    %33 = vector.extract_strided_slice %29 {offsets = [0, 0], sizes = [1, 128], strides = [1, 1]} : vector<8x128xf32> to vector<1x128xf32>
    %cst_31 = arith.constant dense<0.000000e+00> : vector<1x128xf32>
    %34 = tpu.matmul %31, %30, %cst_31 {dimension_numbers = #tpu.dot_dimension_numbers<[1], [0], [0], [1], [0, 0, 1, 1], [], []>} : vector<1x32xf32>, vector<32x128xf32>, vector<1x128xf32> -> vector<1x128xf32>
    %35 = arith.addf %33, %34 : vector<1x128xf32>
    %36 = arith.negf %35 : vector<1x128xf32>
    %37 = math.exp %36 : vector<1x128xf32>
    %cst_32 = arith.constant 1.000000e+00 : f32
    %38 = vector.broadcast %cst_32 : f32 to vector<1x128xf32>
    %39 = arith.addf %38, %37 : vector<1x128xf32>
    %40 = arith.divf %38, %39 : vector<1x128xf32>
    %41 = math.tanh %35 : vector<1x128xf32>
    %42 = vector.extract_strided_slice %40 {offsets = [0, 0], sizes = [1, 32], strides = [1, 1]} : vector<1x128xf32> to vector<1x32xf32>
    %43 = vector.extract_strided_slice %40 {offsets = [0, 32], sizes = [1, 32], strides = [1, 1]} : vector<1x128xf32> to vector<1x32xf32>
    %44 = vector.extract_strided_slice %40 {offsets = [0, 64], sizes = [1, 32], strides = [1, 1]} : vector<1x128xf32> to vector<1x32xf32>
    %45 = vector.extract_strided_slice %41 {offsets = [0, 96], sizes = [1, 32], strides = [1, 1]} : vector<1x128xf32> to vector<1x32xf32>
    %46 = arith.mulf %43, %32 : vector<1x32xf32>
    %47 = arith.mulf %42, %45 : vector<1x32xf32>
    %48 = arith.addf %46, %47 : vector<1x32xf32>
    %49 = math.tanh %48 : vector<1x32xf32>
    %50 = arith.mulf %44, %49 : vector<1x32xf32>
    %c0_33 = arith.constant 0 : index
    %c0_34 = arith.constant 0 : index
    %51 = vector.load %arg9[%c0_33, %c0_34] : memref<8x32xf32, #tpu.memory_space<vmem>>, vector<1x32xf32>
    tpu.vector_store %arg9[%c0_33, %c0_34], %50 {strides = array<i32>} : memref<8x32xf32, #tpu.memory_space<vmem>>, vector<1x32xf32>,
    %52 = vector.extract_strided_slice %29 {offsets = [1, 0], sizes = [1, 128], strides = [1, 1]} : vector<8x128xf32> to vector<1x128xf32>
    %cst_35 = arith.constant dense<0.000000e+00> : vector<1x128xf32>
    %53 = tpu.matmul %50, %30, %cst_35 {dimension_numbers = #tpu.dot_dimension_numbers<[1], [0], [0], [1], [0, 0, 1, 1], [], []>} : vector<1x32xf32>, vector<32x128xf32>, vector<1x128xf32> -> vector<1x128xf32>
    %54 = arith.addf %52, %53 : vector<1x128xf32>
    %55 = arith.negf %54 : vector<1x128xf32>
    %56 = math.exp %55 : vector<1x128xf32>
    %cst_36 = arith.constant 1.000000e+00 : f32
    %57 = vector.broadcast %cst_36 : f32 to vector<1x128xf32>
    %58 = arith.addf %57, %56 : vector<1x128xf32>
    %59 = arith.divf %57, %58 : vector<1x128xf32>
    %60 = math.tanh %54 : vector<1x128xf32>
    %61 = vector.extract_strided_slice %59 {offsets = [0, 0], sizes = [1, 32], strides = [1, 1]} : vector<1x128xf32> to vector<1x32xf32>
    %62 = vector.extract_strided_slice %59 {offsets = [0, 32], sizes = [1, 32], strides = [1, 1]} : vector<1x128xf32> to vector<1x32xf32>
    %63 = vector.extract_strided_slice %59 {offsets = [0, 64], sizes = [1, 32], strides = [1, 1]} : vector<1x128xf32> to vector<1x32xf32>
    %64 = vector.extract_strided_slice %60 {offsets = [0, 96], sizes = [1, 32], strides = [1, 1]} : vector<1x128xf32> to vector<1x32xf32>
    %65 = arith.mulf %62, %48 : vector<1x32xf32>
    %66 = arith.mulf %61, %64 : vector<1x32xf32>
    %67 = arith.addf %65, %66 : vector<1x32xf32>
    %68 = math.tanh %67 : vector<1x32xf32>
    %69 = arith.mulf %63, %68 : vector<1x32xf32>
    %c1_37 = arith.constant 1 : index
    %c0_38 = arith.constant 0 : index
    %70 = vector.load %arg9[%c1_37, %c0_38] : memref<8x32xf32, #tpu.memory_space<vmem>>, vector<1x32xf32>
    tpu.vector_store %arg9[%c1_37, %c0_38], %69 {strides = array<i32>} : memref<8x32xf32, #tpu.memory_space<vmem>>, vector<1x32xf32>,
    %71 = vector.extract_strided_slice %29 {offsets = [2, 0], sizes = [1, 128], strides = [1, 1]} : vector<8x128xf32> to vector<1x128xf32>
    %cst_39 = arith.constant dense<0.000000e+00> : vector<1x128xf32>
    %72 = tpu.matmul %69, %30, %cst_39 {dimension_numbers = #tpu.dot_dimension_numbers<[1], [0], [0], [1], [0, 0, 1, 1], [], []>} : vector<1x32xf32>, vector<32x128xf32>, vector<1x128xf32> -> vector<1x128xf32>
    %73 = arith.addf %71, %72 : vector<1x128xf32>
    %74 = arith.negf %73 : vector<1x128xf32>
    %75 = math.exp %74 : vector<1x128xf32>
    %cst_40 = arith.constant 1.000000e+00 : f32
    %76 = vector.broadcast %cst_40 : f32 to vector<1x128xf32>
    %77 = arith.addf %76, %75 : vector<1x128xf32>
    %78 = arith.divf %76, %77 : vector<1x128xf32>
    %79 = math.tanh %73 : vector<1x128xf32>
    %80 = vector.extract_strided_slice %78 {offsets = [0, 0], sizes = [1, 32], strides = [1, 1]} : vector<1x128xf32> to vector<1x32xf32>
    %81 = vector.extract_strided_slice %78 {offsets = [0, 32], sizes = [1, 32], strides = [1, 1]} : vector<1x128xf32> to vector<1x32xf32>
    %82 = vector.extract_strided_slice %78 {offsets = [0, 64], sizes = [1, 32], strides = [1, 1]} : vector<1x128xf32> to vector<1x32xf32>
    %83 = vector.extract_strided_slice %79 {offsets = [0, 96], sizes = [1, 32], strides = [1, 1]} : vector<1x128xf32> to vector<1x32xf32>
    %84 = arith.mulf %81, %67 : vector<1x32xf32>
    %85 = arith.mulf %80, %83 : vector<1x32xf32>
    %86 = arith.addf %84, %85 : vector<1x32xf32>
    %87 = math.tanh %86 : vector<1x32xf32>
    %88 = arith.mulf %82, %87 : vector<1x32xf32>
    %c2_41 = arith.constant 2 : index
    %c0_42 = arith.constant 0 : index
    %89 = vector.load %arg9[%c2_41, %c0_42] : memref<8x32xf32, #tpu.memory_space<vmem>>, vector<1x32xf32>
    tpu.vector_store %arg9[%c2_41, %c0_42], %88 {strides = array<i32>} : memref<8x32xf32, #tpu.memory_space<vmem>>, vector<1x32xf32>,
    %90 = vector.extract_strided_slice %29 {offsets = [3, 0], sizes = [1, 128], strides = [1, 1]} : vector<8x128xf32> to vector<1x128xf32>
    %cst_43 = arith.constant dense<0.000000e+00> : vector<1x128xf32>
    %91 = tpu.matmul %88, %30, %cst_43 {dimension_numbers = #tpu.dot_dimension_numbers<[1], [0], [0], [1], [0, 0, 1, 1], [], []>} : vector<1x32xf32>, vector<32x128xf32>, vector<1x128xf32> -> vector<1x128xf32>
    %92 = arith.addf %90, %91 : vector<1x128xf32>
    %93 = arith.negf %92 : vector<1x128xf32>
    %94 = math.exp %93 : vector<1x128xf32>
    %cst_44 = arith.constant 1.000000e+00 : f32
    %95 = vector.broadcast %cst_44 : f32 to vector<1x128xf32>
    %96 = arith.addf %95, %94 : vector<1x128xf32>
    %97 = arith.divf %95, %96 : vector<1x128xf32>
    %98 = math.tanh %92 : vector<1x128xf32>
    %99 = vector.extract_strided_slice %97 {offsets = [0, 0], sizes = [1, 32], strides = [1, 1]} : vector<1x128xf32> to vector<1x32xf32>
    %100 = vector.extract_strided_slice %97 {offsets = [0, 32], sizes = [1, 32], strides = [1, 1]} : vector<1x128xf32> to vector<1x32xf32>
    %101 = vector.extract_strided_slice %97 {offsets = [0, 64], sizes = [1, 32], strides = [1, 1]} : vector<1x128xf32> to vector<1x32xf32>
    %102 = vector.extract_strided_slice %98 {offsets = [0, 96], sizes = [1, 32], strides = [1, 1]} : vector<1x128xf32> to vector<1x32xf32>
    %103 = arith.mulf %100, %86 : vector<1x32xf32>
    %104 = arith.mulf %99, %102 : vector<1x32xf32>
    %105 = arith.addf %103, %104 : vector<1x32xf32>
    %106 = math.tanh %105 : vector<1x32xf32>
    %107 = arith.mulf %101, %106 : vector<1x32xf32>
    %c3_45 = arith.constant 3 : index
    %c0_46 = arith.constant 0 : index
    %108 = vector.load %arg9[%c3_45, %c0_46] : memref<8x32xf32, #tpu.memory_space<vmem>>, vector<1x32xf32>
    tpu.vector_store %arg9[%c3_45, %c0_46], %107 {strides = array<i32>} : memref<8x32xf32, #tpu.memory_space<vmem>>, vector<1x32xf32>,
    %109 = vector.extract_strided_slice %29 {offsets = [4, 0], sizes = [1, 128], strides = [1, 1]} : vector<8x128xf32> to vector<1x128xf32>
    %cst_47 = arith.constant dense<0.000000e+00> : vector<1x128xf32>
    %110 = tpu.matmul %107, %30, %cst_47 {dimension_numbers = #tpu.dot_dimension_numbers<[1], [0], [0], [1], [0, 0, 1, 1], [], []>} : vector<1x32xf32>, vector<32x128xf32>, vector<1x128xf32> -> vector<1x128xf32>
    %111 = arith.addf %109, %110 : vector<1x128xf32>
    %112 = arith.negf %111 : vector<1x128xf32>
    %113 = math.exp %112 : vector<1x128xf32>
    %cst_48 = arith.constant 1.000000e+00 : f32
    %114 = vector.broadcast %cst_48 : f32 to vector<1x128xf32>
    %115 = arith.addf %114, %113 : vector<1x128xf32>
    %116 = arith.divf %114, %115 : vector<1x128xf32>
    %117 = math.tanh %111 : vector<1x128xf32>
    %118 = vector.extract_strided_slice %116 {offsets = [0, 0], sizes = [1, 32], strides = [1, 1]} : vector<1x128xf32> to vector<1x32xf32>
    %119 = vector.extract_strided_slice %116 {offsets = [0, 32], sizes = [1, 32], strides = [1, 1]} : vector<1x128xf32> to vector<1x32xf32>
    %120 = vector.extract_strided_slice %116 {offsets = [0, 64], sizes = [1, 32], strides = [1, 1]} : vector<1x128xf32> to vector<1x32xf32>
    %121 = vector.extract_strided_slice %117 {offsets = [0, 96], sizes = [1, 32], strides = [1, 1]} : vector<1x128xf32> to vector<1x32xf32>
    %122 = arith.mulf %119, %105 : vector<1x32xf32>
    %123 = arith.mulf %118, %121 : vector<1x32xf32>
    %124 = arith.addf %122, %123 : vector<1x32xf32>
    %125 = math.tanh %124 : vector<1x32xf32>
    %126 = arith.mulf %120, %125 : vector<1x32xf32>
    %c4_49 = arith.constant 4 : index
    %c0_50 = arith.constant 0 : index
    %127 = vector.load %arg9[%c4_49, %c0_50] : memref<8x32xf32, #tpu.memory_space<vmem>>, vector<1x32xf32>
    tpu.vector_store %arg9[%c4_49, %c0_50], %126 {strides = array<i32>} : memref<8x32xf32, #tpu.memory_space<vmem>>, vector<1x32xf32>,
    %c0_51 = arith.constant 0 : index
    %c0_52 = arith.constant 0 : index
    %128 = vector.load %arg9[%c0_51, %c0_52] : memref<8x32xf32, #tpu.memory_space<vmem>>, vector<8x32xf32>
    %c0_53 = arith.constant 0 : index
    %c0_54 = arith.constant 0 : index
    %129 = vector.load %arg5[%c0_53, %c0_54] : memref<32x128xf32, #tpu.memory_space<vmem>>, vector<32x128xf32>
    %cst_55 = arith.constant dense<0.000000e+00> : vector<8x128xf32>
    %130 = tpu.matmul %128, %129, %cst_55 {dimension_numbers = #tpu.dot_dimension_numbers<[1], [0], [0], [1], [0, 0, 1, 1], [], []>} : vector<8x32xf32>, vector<32x128xf32>, vector<8x128xf32> -> vector<8x128xf32>
    %c0_56 = arith.constant 0 : index
    %c0_57 = arith.constant 0 : index
    %131 = vector.load %arg6[%c0_56, %c0_57] : memref<1x128xf32, #tpu.memory_space<vmem>>, vector<1x128xf32>
    %132 = vector.broadcast %131 : vector<1x128xf32> to vector<8x128xf32>
    %133 = arith.addf %130, %132 : vector<8x128xf32>
    %cst_58 = arith.constant dense<0xFF800000> : vector<8xf32>
    %134 = vector.multi_reduction <maximumf>, %133, %cst_58 [1] : vector<8x128xf32> to vector<8xf32>
    %135 = vector.shape_cast %134 : vector<8xf32> to vector<8x1xf32>
    %136 = vector.broadcast %135 : vector<8x1xf32> to vector<8x128xf32>
    %137 = arith.subf %133, %136 : vector<8x128xf32>
    %138 = math.exp %137 : vector<8x128xf32>
    %cst_59 = arith.constant dense<0.000000e+00> : vector<8xf32>
    %139 = vector.multi_reduction <add>, %138, %cst_59 [1] : vector<8x128xf32> to vector<8xf32>
    %140 = vector.shape_cast %139 : vector<8xf32> to vector<8x1xf32>
    %141 = math.log %140 : vector<8x1xf32>
    %142 = arith.addf %141, %135 : vector<8x1xf32>
    %143 = vector.broadcast %142 : vector<8x1xf32> to vector<8x128xf32>
    %144 = arith.subf %133, %143 : vector<8x128xf32>
    %c0_60 = arith.constant 0 : index
    %c0_61 = arith.constant 0 : index
    %145 = vector.load %arg7[%c0_60, %c0_61] : memref<8x128xf32, #tpu.memory_space<vmem>>, vector<8x128xf32>
    tpu.vector_store %arg7[%c0_60, %c0_61], %144 {strides = array<i32>} : memref<8x128xf32, #tpu.memory_space<vmem>>, vector<8x128xf32>,
    return
  }
}

</mosaic_0001>

<bundles_post_ra>
// kernel: tpu_custom_call.1
= control target key start
LH: loop header
LB: loop body
LE: loop exit
PB: predicated region body
PF: predicated region fallthrough
CT: control target
= control target key end

     0   :  { %12 = vsyncpa [#allocation7], 0  ;;  %s1472_s0 = inlined_call_operand.hbm [shape: s32[5], index: 0, kind: input, shape index: {}]   ;;  %s1473_s1 = inlined_call_operand.hbm [shape: f32[16,32], index: 1, kind: input, shape index: {}]   ;;  %s1474_s2 = inlined_call_operand.hbm [shape: f32[32,128], index: 2, kind: input, shape index: {}]   ;;  %s1475_s3 = inlined_call_operand.hbm [shape: f32[32,128], index: 3, kind: input, shape index: {}]   ;;  %s1476_s4 = inlined_call_operand.vmem [shape: f32[1,128], index: 4, kind: input, shape index: {}]   ;;  %s1477_s5 = inlined_call_operand.hbm [shape: f32[32,128], index: 5, kind: input, shape index: {}]   ;;  %s1478_s6 = inlined_call_operand.vmem [shape: f32[1,128], index: 6, kind: input, shape index: {}]   ;;  %s1479_s7 = inlined_call_operand.hbm [shape: f32[8,128], index: 7, kind: output, shape index: {}]  }
   0x1   :  { %13 = vsyncpa [#allocation5], 0 }
   0x2   :  { %14 = vsyncpa [#allocation10], 0 }
   0x3   :  { %15 = vsyncpa [#allocation13], 0 }
   0x4   :  { %16 = vsyncpa [#allocation6], 0  ;;  %s1232_s24 = smov [#allocation9]   ;;  %s1233_s26 = smov [#allocation8]  }
   0x5   :  { %s42_s25 = sshll.u32 %s1232_s24, 4  ;;  %s30_s27 = sshll.u32 %s1233_s26, 4  ;;  %s43_s25 = int_to_ptr.vmem [resolvable:$true] %s42_s25  ;;  %s31_s27 = int_to_ptr.vmem [resolvable:$true] %s30_s27 }
   0x6   :  { %s1102_s30 = scalar_lea.hbm %s1474_s2, 512 }
   0x7   :  { %p1103_p0 = scmp.ne.s32.totalorder %s1474_s2, %s1102_s30  ;;  %p1106_p1 = scmp.lt.u32.totalorder %s1102_s30, %s1474_s2 }
   0x9   :  { %p1108_p2 = pnand %p1106_p1, %p1103_p0 }
   0xb   :  { %1111 = shalt.err (!%p1108_p2)
}
   0xc   :  { %s1112_s12 = scalar_lea.vmem %s43_s25, 512  ;;  %p1117_p4 = scmp.lt.s32.totalorder %s43_s25, %s43_s25 }
   0xd   :  { %p1113_p3 = scmp.ne.s32.totalorder %s43_s25, %s1112_s12  ;;  %p1118_p5 = scmp.lt.s32.totalorder %s1112_s12, %s1112_s12 }
   0xf   :  { %p1119_p6 = por %p1118_p5, %p1117_p4 }
  0x11   :  { %p1120_p7 = pnand %p1119_p6, %p1113_p3 }
  0x13   :  { %1123 = shalt.err (!%p1120_p7)
}
  0x14   :  { %s1234_s13 = smov 128   ;;  %s1235_s14 = smov 8  }
  0x15   :  { %48 = dma.hbm_to_vmem [thread:$0]  %s1474_s2, 512, %s43_s25, [#allocation10], %s1234_s13, %s1234_s13, %s1235_s14  }
  0x16   :  { %s1124_s19 = scalar_lea.hbm %s1472_s0, 16 }
  0x17   :  { %p1125_p8 = scmp.ne.s32.totalorder %s1472_s0, %s1124_s19  ;;  %p1128_p9 = scmp.lt.u32.totalorder %s1124_s19, %s1472_s0 }
  0x19   :  { %p1130_p10 = pnand %p1128_p9, %p1125_p8 }
  0x1b   :  { %1133 = shalt.err (!%p1130_p10)
}
  0x1c   :  { %s1236_s24 = smov [#allocation4]   ;;  %s1134_s29 = scalar_lea.hbm %s1473_s1, 256 }
  0x1d   :  { %24 = dma.hbm_to_smem %s1472_s0, 16, %s1236_s24, [#allocation7]  }
  0x1e   :  { %p1135_p11 = scmp.ne.s32.totalorder %s1473_s1, %s1134_s29  ;;  %p1138_p12 = scmp.lt.u32.totalorder %s1134_s29, %s1473_s1 }
  0x20   :  { %p1140_p13 = pnand %p1138_p12, %p1135_p11 }
  0x22   :  { %1143 = shalt.err (!%p1140_p13)
}
  0x23   :  { %s1144_s11 = scalar_lea.vmem %s31_s27, 256  ;;  %p1149_p1 = scmp.lt.s32.totalorder %s31_s27, %s31_s27 }
  0x24   :  { %p1145_p0 = scmp.ne.s32.totalorder %s31_s27, %s1144_s11  ;;  %p1150_p2 = scmp.lt.s32.totalorder %s1144_s11, %s1144_s11 }
  0x26   :  { %p1151_p3 = por %p1150_p2, %p1149_p1 }
  0x28   :  { %p1152_p4 = pnand %p1151_p3, %p1145_p0 }
  0x2a   :  { %1155 = shalt.err (!%p1152_p4)
}
  0x2b   :  { %36 = dma.hbm_to_vmem [thread:$0]  %s1473_s1, 256, %s31_s27, [#allocation5], %s1234_s13, %s1234_s13, %s1235_s14  }
  0x2c   :  { %s1237_s15 = smov [#allocation11]   ;;  %s1238_s17 = smov [#allocation12]  }
  0x2d   :  { %s54_s16 = sshll.u32 %s1237_s15, 4  ;;  %s68_s18 = sshll.u32 %s1238_s17, 4  ;;  %s55_s16 = int_to_ptr.vmem [resolvable:$true] %s54_s16  ;;  %s69_s18 = int_to_ptr.vmem [resolvable:$true] %s68_s18 }
  0x2e   :  { %s1156_s21 = scalar_lea.hbm %s1475_s3, 512 }
  0x2f   :  { %p1157_p5 = scmp.ne.s32.totalorder %s1475_s3, %s1156_s21  ;;  %p1160_p6 = scmp.lt.u32.totalorder %s1156_s21, %s1475_s3 }
  0x31   :  { %p1162_p7 = pnand %p1160_p6, %p1157_p5 }
  0x33   :  { %1165 = shalt.err (!%p1162_p7)
}
  0x34   :  { %s1166_s1 = scalar_lea.vmem %s55_s16, 512  ;;  %p1171_p9 = scmp.lt.s32.totalorder %s55_s16, %s55_s16 }
  0x35   :  { %p1167_p8 = scmp.ne.s32.totalorder %s55_s16, %s1166_s1  ;;  %p1172_p10 = scmp.lt.s32.totalorder %s1166_s1, %s1166_s1 }
  0x37   :  { %p1173_p11 = por %p1172_p10, %p1171_p9 }
  0x39   :  { %p1174_p12 = pnand %p1173_p11, %p1167_p8 }
  0x3b   :  { %1177 = shalt.err (!%p1174_p12)
}
  0x3c   :  { %60 = dma.hbm_to_vmem [thread:$0]  %s1475_s3, 512, %s55_s16, [#allocation10], %s1234_s13, %s1234_s13, %s1235_s14  }
  0x3d   :  { %s1178_s29 = scalar_lea.hbm %s1477_s5, 512 }
  0x3e   :  { %p1179_p13 = scmp.ne.s32.totalorder %s1477_s5, %s1178_s29  ;;  %p1182_p0 = scmp.lt.u32.totalorder %s1178_s29, %s1477_s5 }
  0x40   :  { %p1184_p1 = pnand %p1182_p0, %p1179_p13 }
  0x42   :  { %1187 = shalt.err (!%p1184_p1)
}
  0x43   :  { %s1188_s11 = scalar_lea.vmem %s69_s18, 512  ;;  %p1193_p3 = scmp.lt.s32.totalorder %s69_s18, %s69_s18 }
  0x44   :  { %p1189_p2 = scmp.ne.s32.totalorder %s69_s18, %s1188_s11  ;;  %p1194_p4 = scmp.lt.s32.totalorder %s1188_s11, %s1188_s11 }
  0x46   :  { %p1195_p5 = por %p1194_p4, %p1193_p3 }
  0x48   :  { %p1196_p6 = pnand %p1195_p5, %p1189_p2 }
  0x4a   :  { %1199 = shalt.err (!%p1196_p6)
}
  0x4b   :  { %74 = dma.hbm_to_vmem [thread:$0]  %s1477_s5, 512, %s69_s18, [#allocation13], %s1234_s13, %s1234_s13, %s1235_s14  }
  0x4c   :  { %1222 = dma.done.wait [#allocation7], 16  }
  0x4d   :  { %1223 = vsyncadd [#allocation7], 4294967280 }
  0x4e   :  { %1224 = dma.done.wait [#allocation5], 256  }
  0x4f   :  { %1225 = vsyncadd [#allocation5], 4294967040 }
  0x50   :  { %1226 = dma.done.wait [#allocation10], 1024  }
  0x51   :  { %1227 = vsyncadd [#allocation10], 4294966272 }
  0x52   :  { %1228 = dma.done.wait [#allocation13], 512  }
  0x53   :  { %1229 = vsyncadd [#allocation13], 4294966784 }
  0x54   :  { %92 = sfence }
  0x55   :  { %v118_v0 = vld [vmem:[#allocation9] sm:$0xff]  ;;  %v119_v1 = vld [vmem:[#allocation9 + $0x8] sm:$0xff]  ;;  %v1239_v3 = vmov 0.0|0.0   ;;  %v120_v6 = vld [vmem:[#allocation9 + $0x10] sm:$0xff]  ;;  %vm93_vm0 = vcmask 261120   ;;  %s96_s5 = sld [smem:[#allocation4]] }
  0x56   :  { %v202_v2 = vld [vmem:[#allocation11] sm:$0xff]  ;;  %1003 = vmatprep.subr.bf16.mxu0 %v1239_v3  ;;  %v1004_v4 = vpack.c.bf16 %v119_v1, %v118_v0  ;;  %1009 = vmatprep.subr.bf16.mxu1 %v1239_v3  ;;  %v203_v5 = vld [vmem:[#allocation11 + $0x8] sm:$0xff]  ;;  %v121_v7 = vld [vmem:[#allocation9 + $0x18] sm:$0xff]  ;;  %vm1240_vm1 = vmmov 0   ;;  %v1241_v11 = vmov 0.0   ;;  %s874_s13 = sld [smem:[#allocation4 + $0x1]] }
  0x57   :  { %v1359_v8 = vpack.c.bf16 %v203_v5, %v202_v2  ;;  %v204_v9 = vld [vmem:[#allocation11 + $0x10] sm:$0xff]  ;;  %v205_v10 = vld [vmem:[#allocation11 + $0x18] sm:$0xff]  ;;  %934 = vmatprep.mubr.msk.f32.mxu0 %vm1240_vm1, %v1241_v11  ;;  %94 = vst.msk [vmem:[#allocation2] sm:$0xff] %vm93_vm0, %v1241_v11  ;;  %95 = vst.msk [vmem:[#allocation3] sm:$0xff] %vm93_vm0, %v1241_v11  ;;  %945 = vmatprep.mubr.msk.f32.mxu1 %vm1240_vm1, %v1241_v11  ;;  %v1007_v12 = vpack.c.bf16 %v121_v7, %v120_v6  ;;  %s875_s14 = sld [smem:[#allocation4 + $0x2]]  ;;  %s876_s12 = sld [smem:[#allocation4 + $0x3]] }
  0x58   :  { %1005 = vmatpush3.bf16.msra.mxu0 %v1004_v4  ;;  %v1371_v13 = vpack.c.bf16 %v205_v10, %v204_v9  ;;  %s877_s15 = sld [smem:[#allocation4 + $0x4]]  ;;  %vm99_vm2 = vcmask 253952   ;;  %v878_v22 = vld [vmem:[%s1476_s4] ss:$0 sm:$0xff]  ;;  %s1242_s23 = smov 32   ;;  %vm416_vm3 = vcmask 254977  }
  0x59   :  { %1011 = vmatpush3.bf16.msra.mxu1 %v1359_v8  ;;  %1006 = vmatprep.subr.bf16.mxu0 %v1239_v3  ;;  %s1243_s4 = smov 64   ;;  %vm640_vm4 = vcmask 257027   ;;  %vm528_vm5 = vcmask 256002   ;;  %vm752_vm6 = vcmask 258052   ;;  %s1244_s1 = smov [#allocation14]  }
  0x5a   :  { %1012 = vmatprep.subr.bf16.mxu1 %v1239_v3  ;;  %s857_s27 = sshll.u32 %s1244_s1, 4  ;;  %s858_s27 = int_to_ptr.vmem [resolvable:$true] %s857_s27 }
  0x5b   :  { %s97_s16 = scalar_lea.vmem [#allocation8], %s96_s5  ;;  %p1205_p8 = scmp.lt.s32.totalorder %s858_s27, %s858_s27 }
  0x5c   :  { %1008 = vmatpush3.bf16.msra.mxu0 %v1007_v12  ;;  %v98_v14 = vld [vmem:[%s97_s16] sm:$0x1]  ;;  %s102_s17 = scalar_lea.vmem [#allocation8], %s874_s13 }
  0x5d   :  { %1014 = vmatpush3.bf16.msra.mxu1 %v1371_v13  ;;  %1015 = vmatprep.subr.bf16.mxu0 %v1239_v3  ;;  %100 = vst.msk [vmem:[#allocation2] sm:$0x1] %vm99_vm2, %v98_v14  ;;  %v103_v15 = vld [vmem:[%s102_s17] sm:$0x1]  ;;  %s106_s18 = scalar_lea.vmem [#allocation8], %s875_s14  ;;  %s110_s19 = scalar_lea.vmem [#allocation8], %s876_s12 }
  0x5e   :  { %1021 = vmatprep.subr.bf16.mxu1 %v1239_v3  ;;  %104 = vst.msk [vmem:[#allocation2 + $0x1] sm:$0x1] %vm99_vm2, %v103_v15  ;;  %v107_v16 = vld [vmem:[%s106_s18] sm:$0x1]  ;;  %s114_s20 = scalar_lea.vmem [#allocation8], %s877_s15 }
  0x5f   :  { %v111_v17 = vld [vmem:[%s110_s19] sm:$0x1]  ;;  %108 = vst.msk [vmem:[#allocation2 + $0x2] sm:$0x1] %vm99_vm2, %v107_v16 }
  0x60   :  { %112 = vst.msk [vmem:[#allocation2 + $0x3] sm:$0x1] %vm99_vm2, %v111_v17  ;;  %v115_v18 = vld [vmem:[%s114_s20] sm:$0x1]  ;;  %946 = vmatmul.mubr.f32.vlgmr.msra.gmra.mrb[0].mxu1 %v1241_v11 }
  0x61   :  { %116 = vst.msk [vmem:[#allocation2 + $0x4] sm:$0x1] %vm99_vm2, %v115_v18  ;;  %1023 = vmatpush3.bf16.msra.mxu1 %v1359_v8  ;;  %967 = vmatprep.mubr.msk.f32.mxu1 %vm1240_vm1, %v1241_v11 }
  0x62   :  { %1024 = vmatprep.subr.bf16.mxu1 %v1239_v3 }
  0x65   :  { %1026 = vmatpush3.bf16.msra.mxu1 %v1371_v13 }
  0x66   :  { %1033 = vmatprep.subr.bf16.mxu1 %v1239_v3 }
  0x68   :  { %v117_v19 = vld [vmem:[#allocation2] sm:$0xff] }
  0x69   :  { %935 = vmatmul.mubr.msk.f32.vlgmr.msra.gmra.mrb[0].mxu0 %vm93_vm0, %v117_v19 }
  0x6a   :  { %1017 = vmatpush3.bf16.msra.mxu0 %v1359_v8  ;;  %956 = vmatprep.mubr.msk.f32.mxu0 %vm1240_vm1, %v1241_v11 }
  0x6b   :  { %1018 = vmatprep.subr.bf16.mxu0 %v1239_v3 }
  0x6e   :  { %1020 = vmatpush3.bf16.msra.mxu0 %v1371_v13 }
  0x6f   :  { %1027 = vmatprep.subr.bf16.mxu0 %v1239_v3 }
 0x133   :  { %v275_v20 = vpop.f32.mrb[0].mxu1 }
 0x134   :  { %v947_v21 = vpop.f32.mrb[1].mxu1 }
 0x13c   :  { %v198_v23 = vpop.f32.mrb[0].mxu0 }
 0x13d   :  { %v1399_v24 = vadd.f32 %v878_v22, %v198_v23  ;;  %v936_v25 = vpop.f32.mrb[1].mxu0 }
 0x13f   :  { %v279_v26 = vadd.f32 %v275_v20, %v1399_v24 }
 0x141   :  { %1058 = vtanh.f32 %v279_v26  ;;  %v880_v28 = vmul.f32 -1.442695, %v279_v26 }
 0x143   :  { %1060 = vpow2.f32 %v880_v28 }
 0x14b   :  { %v1059_v27 = vpop.eup %1058 }
 0x14c   :  { %289 = vrot.lane.b32.xlu0 %v1059_v27, %s1242_s23 }
 0x14d   :  { %v1061_v29 = vpop.eup %1060 }
 0x14e   :  { %v283_v30 = vadd.f32 1.0, %v1061_v29 }
 0x150   :  { %1062 = vrcp.f32 %v283_v30 }
 0x15a   :  { %v1063_v31 = vpop.eup %1062 }
 0x15b   :  { %v287_v34 = vmul.f32 0.0, %v1063_v31 }
 0x1be   :  { %v290_v32 = vpop.permute.xlu0 %289 }
 0x1bf   :  { %v292_v33 = vmul.f32 %v1063_v31, %v290_v32 }
 0x1c1   :  { %294 = vrot.lane.b32.xlu0 %v292_v33, %s1242_s23 }
 0x233   :  { %v295_v35 = vpop.permute.xlu0 %294 }
 0x234   :  { %v297_v36 = vadd.f32 %v295_v35, %v287_v34 }
 0x236   :  { %1064 = vtanh.f32 %v297_v36  ;;  %v393_v52 = vrot.slane %v297_v36, 7 }
 0x240   :  { %v1065_v37 = vpop.eup %1064 }
 0x241   :  { %300 = vrot.lane.b32.xlu1 %v1065_v37, %s1242_s23 }
 0x2b3   :  { %v301_v38 = vpop.permute.xlu1 %300 }
 0x2b4   :  { %v303_v39 = vmul.f32 %v1063_v31, %v301_v38 }
 0x2b6   :  { %305 = vrot.lane.b32.xlu1 %v303_v39, %s1243_s4 }
 0x328   :  { %v306_v40 = vpop.permute.xlu1 %305 }
 0x329   :  { %308 = vst.msk [vmem:[#allocation3] sm:$0x1] %vm99_vm2, %v306_v40  ;;  %957 = vmatmul.mubr.msk.f32.vlgmr.msra.gmra.mrb[2].mxu0 %vm93_vm0, %v306_v40 }
 0x32a   :  { %1029 = vmatpush3.bf16.msra.mxu0 %v1359_v8  ;;  %978 = vmatprep.mubr.msk.f32.mxu0 %vm1240_vm1, %v1241_v11 }
 0x32b   :  { %1030 = vmatprep.subr.bf16.mxu0 %v1239_v3 }
 0x32e   :  { %1032 = vmatpush3.bf16.msra.mxu0 %v1371_v13 }
 0x32f   :  { %1039 = vmatprep.subr.bf16.mxu0 %v1239_v3 }
 0x3fc   :  { %v377_v41 = vpop.f32.mrb[2].mxu0 }
 0x3fd   :  { %v382_v42 = vrot.slane %v377_v41, 7  ;;  %v958_v43 = vpop.f32.mrb[3].mxu0 }
 0x3ff   :  { %v384_v44 = vadd.f32 %v382_v42, %v1399_v24 }
 0x401   :  { %1066 = vtanh.f32 %v384_v44  ;;  %v882_v46 = vmul.f32 -1.442695, %v384_v44 }
 0x403   :  { %1068 = vpow2.f32 %v882_v46 }
 0x40b   :  { %v1067_v45 = vpop.eup %1066 }
 0x40c   :  { %397 = vrot.lane.b32.xlu0 %v1067_v45, %s1242_s23 }
 0x40d   :  { %v1069_v47 = vpop.eup %1068 }
 0x40e   :  { %v388_v48 = vadd.f32 1.0, %v1069_v47 }
 0x410   :  { %1070 = vrcp.f32 %v388_v48 }
 0x41a   :  { %v1071_v49 = vpop.eup %1070 }
 0x41b   :  { %v395_v53 = vmul.f32 %v1071_v49, %v393_v52 }
 0x47e   :  { %v398_v50 = vpop.permute.xlu0 %397 }
 0x47f   :  { %v400_v51 = vmul.f32 %v1071_v49, %v398_v50 }
 0x481   :  { %402 = vrot.lane.b32.xlu1 %v400_v51, %s1242_s23 }
 0x4f3   :  { %v403_v54 = vpop.permute.xlu1 %402 }
 0x4f4   :  { %v405_v55 = vadd.f32 %v403_v54, %v395_v53 }
 0x4f6   :  { %1072 = vtanh.f32 %v405_v55  ;;  %v505_v9 = vrot.slane %v405_v55, 7 }
 0x500   :  { %v1073_v56 = vpop.eup %1072 }
 0x501   :  { %408 = vrot.lane.b32.xlu0 %v1073_v56, %s1242_s23  ;;  %v755_v56 = vld [vmem:[#allocation12] sm:$0xff] }
 0x573   :  { %v409_v57 = vpop.permute.xlu0 %408 }
 0x574   :  { %v1418_v58 = vmul.f32 %v1071_v49, %v409_v57  ;;  %v756_v57 = vld [vmem:[#allocation12 + $0x8] sm:$0xff] }
 0x576   :  { %v418_v59 = vrot.slane %v1418_v58, 1 }
 0x578   :  { %419 = vrot.lane.b32.xlu1 %v418_v59, %s1243_s4  ;;  %v757_v59 = vld [vmem:[#allocation12 + $0x10] sm:$0xff] }
 0x5ea   :  { %v420_v60 = vpop.permute.xlu1 %419 }
 0x5eb   :  { %968 = vmatmul.mubr.msk.f32.vlgmr.msra.gmra.mrb[2].mxu1 %vm93_vm0, %v420_v60  ;;  %v758_v60 = vld [vmem:[#allocation12 + $0x18] sm:$0xff] }
 0x5ec   :  { %1035 = vmatpush3.bf16.msra.mxu1 %v1359_v8  ;;  %989 = vmatprep.mubr.msk.f32.mxu1 %vm1240_vm1, %v1241_v11 }
 0x5ed   :  { %1036 = vmatprep.subr.bf16.mxu1 %v1239_v3 }
 0x5f0   :  { %1038 = vmatpush3.bf16.msra.mxu1 %v1371_v13 }
 0x6be   :  { %v489_v61 = vpop.f32.mrb[2].mxu1 }
 0x6bf   :  { %v494_v62 = vrot.slane %v489_v61, 6  ;;  %v969_v63 = vpop.f32.mrb[3].mxu1  ;;  %v1043_v61 = vpack.c.bf16 %v758_v60, %v757_v59 }
 0x6c1   :  { %v496_v0 = vadd.f32 %v494_v62, %v1399_v24 }
 0x6c3   :  { %1074 = vtanh.f32 %v496_v0  ;;  %v884_v2 = vmul.f32 -1.442695, %v496_v0 }
 0x6c5   :  { %1076 = vpow2.f32 %v884_v2 }
 0x6cd   :  { %v1075_v1 = vpop.eup %1074 }
 0x6ce   :  { %509 = vrot.lane.b32.xlu0 %v1075_v1, %s1242_s23 }
 0x6cf   :  { %v1077_v4 = vpop.eup %1076 }
 0x6d0   :  { %v500_v5 = vadd.f32 1.0, %v1077_v4  ;;  %v889_v4 = vld [vmem:[%s1478_s6] ss:$0 sm:$0xff]  ;;  %s1200_s6 = scalar_lea.vmem %s858_s27, 128 }
 0x6d1   :  { %p1201_p7 = scmp.ne.s32.totalorder %s858_s27, %s1200_s6  ;;  %p1206_p9 = scmp.lt.s32.totalorder %s1200_s6, %s1200_s6 }
 0x6d2   :  { %1078 = vrcp.f32 %v500_v5 }
 0x6d3   :  { %p1207_p10 = por %p1206_p9, %p1205_p8 }
 0x6d5   :  { %p1208_p11 = pnand %p1207_p10, %p1201_p7 }
 0x6dc   :  { %v1079_v6 = vpop.eup %1078 }
 0x6dd   :  { %v507_v10 = vmul.f32 %v1079_v6, %v505_v9 }
 0x740   :  { %v510_v7 = vpop.permute.xlu0 %509 }
 0x741   :  { %v512_v8 = vmul.f32 %v1079_v6, %v510_v7 }
 0x743   :  { %514 = vrot.lane.b32.xlu1 %v512_v8, %s1242_s23 }
 0x7b5   :  { %v515_v12 = vpop.permute.xlu1 %514 }
 0x7b6   :  { %v517_v13 = vadd.f32 %v515_v12, %v507_v10 }
 0x7b8   :  { %1080 = vtanh.f32 %v517_v13 }
 0x7c2   :  { %v1081_v14 = vpop.eup %1080 }
 0x7c3   :  { %520 = vrot.lane.b32.xlu0 %v1081_v14, %s1242_s23 }
 0x835   :  { %v521_v15 = vpop.permute.xlu0 %520 }
 0x836   :  { %v1432_v16 = vmul.f32 %v1079_v6, %v521_v15 }
 0x838   :  { %v530_v17 = vrot.slane %v1432_v16, 2 }
 0x83a   :  { %531 = vrot.lane.b32.xlu1 %v530_v17, %s1243_s4 }
 0x8ac   :  { %v532_v18 = vpop.permute.xlu1 %531 }
 0x8ad   :  { %979 = vmatmul.mubr.msk.f32.vlgmr.msra.gmra.mrb[4].mxu0 %vm93_vm0, %v532_v18 }
 0x8ae   :  { %1000 = vmatprep.mubr.msk.f32.mxu0 %vm1240_vm1, %v1241_v11  ;;  %v617_v11 = vrot.slane %v517_v13, 7 }
 0x980   :  { %v601_v19 = vpop.f32.mrb[4].mxu0 }
 0x981   :  { %v606_v20 = vrot.slane %v601_v19, 5  ;;  %v980_v21 = vpop.f32.mrb[5].mxu0 }
 0x983   :  { %v608_v22 = vadd.f32 %v606_v20, %v1399_v24 }
 0x985   :  { %1082 = vtanh.f32 %v608_v22  ;;  %v886_v25 = vmul.f32 -1.442695, %v608_v22 }
 0x987   :  { %1084 = vpow2.f32 %v886_v25 }
 0x98f   :  { %v1083_v23 = vpop.eup %1082 }
 0x990   :  { %621 = vrot.lane.b32.xlu0 %v1083_v23, %s1242_s23 }
 0x991   :  { %v1085_v26 = vpop.eup %1084 }
 0x992   :  { %v612_v27 = vadd.f32 1.0, %v1085_v26 }
 0x994   :  { %1086 = vrcp.f32 %v612_v27 }
 0x99e   :  { %v1087_v28 = vpop.eup %1086 }
 0x99f   :  { %v619_v31 = vmul.f32 %v1087_v28, %v617_v11 }
 0xa02   :  { %v622_v29 = vpop.permute.xlu0 %621 }
 0xa03   :  { %v624_v30 = vmul.f32 %v1087_v28, %v622_v29 }
 0xa05   :  { %626 = vrot.lane.b32.xlu1 %v624_v30, %s1242_s23 }
 0xa77   :  { %v627_v32 = vpop.permute.xlu1 %626 }
 0xa78   :  { %v629_v33 = vadd.f32 %v627_v32, %v619_v31 }
 0xa7a   :  { %1088 = vtanh.f32 %v629_v33 }
 0xa84   :  { %v1089_v34 = vpop.eup %1088 }
 0xa85   :  { %632 = vrot.lane.b32.xlu0 %v1089_v34, %s1242_s23 }
 0xaf7   :  { %v633_v35 = vpop.permute.xlu0 %632 }
 0xaf8   :  { %v635_v36 = vmul.f32 %v1087_v28, %v633_v35 }
 0xafa   :  { %v642_v37 = vrot.slane %v635_v36, 3 }
 0xafc   :  { %643 = vrot.lane.b32.xlu1 %v642_v37, %s1243_s4 }
 0xb6e   :  { %v644_v38 = vpop.permute.xlu1 %643 }
 0xb6f   :  { %990 = vmatmul.mubr.msk.f32.vlgmr.msra.gmra.mrb[4].mxu1 %vm93_vm0, %v644_v38 }
 0xc42   :  { %v713_v39 = vpop.f32.mrb[4].mxu1 }
 0xc43   :  { %v718_v40 = vrot.slane %v713_v39, 4  ;;  %v991_v41 = vpop.f32.mrb[5].mxu1 }
 0xc45   :  { %v720_v42 = vadd.f32 %v718_v40, %v1399_v24  ;;  %v729_v24 = vrot.slane %v629_v33, 7 }
 0xc47   :  { %1090 = vtanh.f32 %v720_v42  ;;  %v888_v44 = vmul.f32 -1.442695, %v720_v42 }
 0xc49   :  { %1092 = vpow2.f32 %v888_v44 }
 0xc51   :  { %v1091_v43 = vpop.eup %1090 }
 0xc52   :  { %733 = vrot.lane.b32.xlu0 %v1091_v43, %s1242_s23 }
 0xc53   :  { %v1093_v45 = vpop.eup %1092 }
 0xc54   :  { %v724_v46 = vadd.f32 1.0, %v1093_v45 }
 0xc56   :  { %1094 = vrcp.f32 %v724_v46 }
 0xc60   :  { %v1095_v47 = vpop.eup %1094 }
 0xc61   :  { %v731_v50 = vmul.f32 %v1095_v47, %v729_v24 }
 0xcc4   :  { %v734_v48 = vpop.permute.xlu0 %733 }
 0xcc5   :  { %v736_v49 = vmul.f32 %v1095_v47, %v734_v48 }
 0xcc7   :  { %738 = vrot.lane.b32.xlu1 %v736_v49, %s1242_s23 }
 0xccb   :  { %413 = vrot.lane.b32.xlu1 %v1418_v58, %s1243_s4  ;;  %v1040_v58 = vpack.c.bf16 %v756_v57, %v755_v56 }
 0xccd   :  { %1041 = vmatpush3.bf16.msra.mxu0 %v1040_v58 }
 0xcce   :  { %1042 = vmatprep.subr.bf16.mxu0 %v1239_v3 }
 0xccf   :  { %637 = vrot.lane.b32.xlu1 %v635_v36, %s1243_s4 }
 0xcd1   :  { %1044 = vmatpush3.bf16.msra.mxu0 %v1043_v61 }
 0xd39   :  { %v739_v51 = vpop.permute.xlu1 %738 }
 0xd3a   :  { %v741_v52 = vadd.f32 %v739_v51, %v731_v50 }
 0xd3c   :  { %1096 = vtanh.f32 %v741_v52 }
 0xd3d   :  { %v414_v53 = vpop.permute.xlu1 %413 }
 0xd3e   :  { %417 = vst.msk [vmem:[#allocation3] sm:$0x2] %vm416_vm3, %v414_v53 }
 0xd41   :  { %v638_v54 = vpop.permute.xlu1 %637 }
 0xd42   :  { %641 = vst.msk [vmem:[#allocation3] sm:$0x8] %vm640_vm4, %v638_v54 }
 0xd46   :  { %v1097_v55 = vpop.eup %1096 }
 0xd47   :  { %744 = vrot.lane.b32.xlu0 %v1097_v55, %s1242_s23 }
 0xd4b   :  { %525 = vrot.lane.b32.xlu0 %v1432_v16, %s1243_s4 }
 0xdb9   :  { %v745_v62 = vpop.permute.xlu0 %744 }
 0xdba   :  { %v747_v63 = vmul.f32 %v1095_v47, %v745_v62 }
 0xdbc   :  { %749 = vrot.lane.b32.xlu0 %v747_v63, %s1243_s4 }
 0xdbd   :  { %v526_v0 = vpop.permute.xlu0 %525 }
 0xdbe   :  { %529 = vst.msk [vmem:[#allocation3] sm:$0x4] %vm528_vm5, %v526_v0 }
 0xe2e   :  { %v750_v1 = vpop.permute.xlu0 %749 }
 0xe2f   :  { %753 = vst.msk [vmem:[#allocation3] sm:$0x10] %vm752_vm6, %v750_v1 }
 0xe36   :  { %v754_v2 = vld [vmem:[#allocation3] sm:$0xff] }
 0xe37   :  { %1001 = vmatmul.mubr.msk.f32.vlgmr.msra.gmra.mrb[6].mxu0 %vm93_vm0, %v754_v2 }
 0xf0a   :  { %v835_v5 = vpop.f32.mrb[6].mxu0 }
 0xf0b   :  { %v836_v3 = vadd.f32 %v889_v4, %v835_v5  ;;  %v1002_v6 = vpop.f32.mrb[7].mxu0 }
 0xf0d   :  { %839 = vmax.xlane.f32.xlu1 %v836_v3 }
 0xf9a   :  { %v840_v7 = vpop.xlane.xlu1 %839 }
 0xf9b   :  { %v841_v8 = vsub.f32 %v836_v3, %v840_v7 }
 0xf9d   :  { %v842_v9 = vmul.f32 1.442695, %v841_v8 }
 0xf9f   :  { %1098 = vpow2.f32 %v842_v9 }
 0xfa9   :  { %v1099_v10 = vpop.eup %1098 }
 0xfaa   :  { %844 = vadd.xlane.f32.xlu0 %v1099_v10 }
0x1037   :  { %v845_v12 = vpop.xlane.xlu0 %844 }
0x1038   :  { %1100 = vlog2.f32 %v845_v12 }
0x1042   :  { %v1101_v13 = vpop.eup %1100 }
0x1043   :  { %v847_v14 = vmul.f32 0.6931472, %v1101_v13 }
0x1045   :  { %v848_v15 = vadd.f32 %v847_v14, %v840_v7 }
0x1047   :  { %v849_v16 = vsub.f32 %v836_v3, %v848_v15 }
0x1049   :  { %850 = vst [vmem:[#allocation14] sm:$0xff] %v849_v16 }
0x104a   :  { %1211 = shalt.err (!%p1208_p11)
}
0x104b   :  { %s1212_s25 = scalar_lea.hbm %s1479_s7, 128 }
0x104c   :  { %p1213_p12 = scmp.ne.s32.totalorder %s1479_s7, %s1212_s25  ;;  %p1216_p13 = scmp.lt.u32.totalorder %s1212_s25, %s1479_s7 }
0x104e   :  { %p1218_p0 = pnand %p1216_p13, %p1213_p12 }
0x1050   :  { %1221 = shalt.err (!%p1218_p0)
}
0x1051   :  { %860 = dma.vmem_to_hbm [thread:$0]  %s858_s27, 128, %s1479_s7, [#allocation6]  }
0x1052   :  { %1230 = dma.done.wait [#allocation6], 128  }
0x1053   :  { %1231 = vsyncadd [#allocation6], 4294967168 }
0x1054   :  { %864 = vsyncpa [#allocation5], 1 }
0x1055   :  { %865 = vsyncpa [#allocation10], 1 }
0x1056   :  { %866 = vsyncpa [#allocation13], 1 }
0x1057   :  { %867 = vsyncpa [#allocation6], 1 }
0x1058   :  { %868 = vsyncpa [#allocation7], 1 }

</bundles_post_ra>
